<compile_context>
chip_gen: v7x
topology: tpu7x:2x2x1
jax: 0.10.0
libtpu: 0.0.40
codegen_flags: <defaults>
</compile_context>

<pallas_src>
import functools

import jax
import jax.numpy as jnp
from jax.experimental import pallas as pl
from jax.experimental.pallas import tpu as pltpu

_EPS = 1e-12  # F.normalize default eps


def _cdiv(a, b):
    return -(-a // b)


def _l2_normalize(x):
    # F.normalize(x, dim=-1) == x / max(||x||, eps) == x * rsqrt(max(ss, eps^2))
    ss = jnp.sum(x * x, axis=-1, keepdims=True)
    return x * jax.lax.rsqrt(jnp.maximum(ss, _EPS * _EPS))


def _vmem_limit_bytes():
    cap = None
    try:
        info = pltpu.get_tpu_info()
        cap = getattr(info, "vmem_capacity_bytes", None)
    except Exception:
        cap = None
    if not cap:
        return 48 * 1024 * 1024          # safe on v5e/v6e/v7x
    return int(max(32 * 1024 * 1024, min(100 * 1024 * 1024, int(cap * 0.70))))


def _pick_tile(n, desired_tn):
    n128 = _cdiv(n, 128) * 128
    tn = max(128, min(desired_tn, n128))
    n_pad = _cdiv(n, tn) * tn
    return tn, n_pad


def _self_cols(batch_indices, b):
    """Self-mask columns: supports ttl[rows, cols] = 0 with one column per row.

    TODO(synk): boolean-mask / row-only / duplicate-row advanced indexing is
    not representable in the analytic self-mask correction used here.
    """
    if isinstance(batch_indices, (tuple, list)) and len(batch_indices) == 2:
        r = jnp.asarray(batch_indices[0], jnp.int32)
        c = jnp.asarray(batch_indices[1], jnp.int32)
        return jnp.zeros((b,), jnp.int32).at[r].set(c)
    return jnp.asarray(batch_indices, jnp.int32).reshape(b)


# --------------------------------------------------------------------------
# user-side kernel: tiled over N; Neighbor_mat rows gathered with manual DMAs
# --------------------------------------------------------------------------
def _user_side_kernel(rows_ref,                       # scalar prefetch (B,) i32
                      tgt_ref, alln_ref, norms_ref,   # (B,D) f32, (TN,D) bf16, (1,TN) f32
                      nbr_hbm,                        # raw HBM ref (pl.ANY), (N, N_pad) f32
                      nbr_out, ttl_out,               # (B,D) f32, (B,128) f32
                      nbr_buf, sem,                   # gather buffer + DMA sem(s)
                      *, tn, resident):
    k = pl.program_id(0)
    nk = pl.num_programs(0)
    b_sz = tgt_ref.shape[0]

    @pl.when(k == 0)
    def _():
        nbr_out[...] = jnp.zeros_like(nbr_out)
        ttl_out[...] = jnp.zeros_like(ttl_out)

    if resident:
        # -------- gather the B full Neighbor_mat rows once (resident) --------
        n_pad = nbr_buf.shape[1]

        @pl.when(k == 0)
        def _():
            @pl.loop(0, b_sz)
            def _(b):
                pltpu.make_async_copy(
                    nbr_hbm.at[pl.ds(rows_ref[b], 1), pl.ds(0, n_pad)],
                    nbr_buf.at[pl.ds(b, 1), :],
                    sem).start()

            # size-matched waits against the single shared semaphore
            @pl.loop(0, b_sz)
            def _(b):
                pltpu.make_async_copy(
                    nbr_hbm.at[pl.ds(rows_ref[b], 1), pl.ds(0, n_pad)],
                    nbr_buf.at[pl.ds(b, 1), :],
                    sem).wait()

        col0 = pl.multiple_of(k * tn, tn)
        nbr_rows = nbr_buf[:, pl.ds(col0, tn)]                 # (B, TN) f32
    else:
        # -------- per-tile double-buffered gather (large B * N_pad) ----------
        slot = k % 2

        def gather(tile, s):
            col0 = tile * tn

            @pl.loop(0, b_sz)
            def _(b):
                pltpu.make_async_copy(
                    nbr_hbm.at[pl.ds(rows_ref[b], 1), pl.ds(col0, tn)],
                    nbr_buf.at[s, pl.ds(b, 1), :],
                    sem.at[s]).start()

        def wait_gather(tile, s):
            col0 = tile * tn

            @pl.loop(0, b_sz)
            def _(b):
                pltpu.make_async_copy(
                    nbr_hbm.at[pl.ds(rows_ref[b], 1), pl.ds(col0, tn)],
                    nbr_buf.at[s, pl.ds(b, 1), :],
                    sem.at[s]).wait()

        @pl.when(k == 0)
        def _():
            gather(0, 0)

        wait_gather(k, slot)

        @pl.when(k + 1 < nk)
        def _():
            gather(k + 1, 1 - slot)

        nbr_rows = nbr_buf[slot]                               # (B, TN) f32

    # ----- compute on the current N-tile (all normalization pre-hoisted) -----
    all_n16 = alln_ref[...]                                    # (TN, D) bf16, pre-normalized
    norms = norms_ref[...]                                     # (1, TN) f32 row norms
    tgt16 = tgt_ref[...].astype(jnp.bfloat16)                  # (B, D), 1/temp pre-folded

    # neighbor aggregation on UN-normalized all_aux:
    #   nbr @ all_raw == (nbr * norms) @ all_n        [MXU, f32 accumulation]
    nbr_scaled16 = (nbr_rows * norms).astype(jnp.bfloat16)
    nbr_out[...] += jnp.dot(nbr_scaled16, all_n16,
                            preferred_element_type=jnp.float32)

    # ttl scores (already divided by temp):  (B,D) x (TN,D)^T -> (B,TN)  [MXU]
    # (same q·kᵀ contraction as flash attention; no per-tile transpose seen)
    score = jax.lax.dot_general(tgt16, all_n16, (((1,), (1,)), ((), ())),
                                preferred_element_type=jnp.float32)
    # exp without max-subtraction is safe: |score| <= 1/temp (cosine sims),
    # identical to the torch reference's behaviour.
    e = jnp.exp(score)                                         # padded cols -> exp(0)=1
    partial = e[:, 0:128]
    for j in range(1, tn // 128):                              # lane-wise accumulation (VPU)
        partial = partial + e[:, j * 128:(j + 1) * 128]
    ttl_out[...] += partial


# --------------------------------------------------------------------------
# item-side kernel: tiled over N (no gather, no per-step normalization)
# --------------------------------------------------------------------------
def _item_side_kernel(tgt_ref, alln_ref, ttl_out, *, tn):
    k = pl.program_id(0)

    @pl.when(k == 0)
    def _():
        ttl_out[...] = jnp.zeros_like(ttl_out)

    tgt16 = tgt_ref[...].astype(jnp.bfloat16)
    score = jax.lax.dot_general(tgt16, alln_ref[...], (((1,), (1,)), ((), ())),
                                preferred_element_type=jnp.float32)
    e = jnp.exp(score)
    partial = e[:, 0:128]
    for j in range(1, tn // 128):
        partial = partial + e[:, j * 128:(j + 1) * 128]
    ttl_out[...] += partial


# --------------------------------------------------------------------------
# pallas_call wrappers
# --------------------------------------------------------------------------
def _user_side_call(rows, tgt_scaled, all_n, norms, nbr_pad,
                    *, tn, resident, vmem_limit):
    b, d = tgt_scaled.shape
    n_pad = all_n.shape[0]
    nk = n_pad // tn
    if resident:
        scratch = [pltpu.VMEM((b, n_pad), jnp.float32),
                   pltpu.SemaphoreType.DMA(())]
    else:
        scratch = [pltpu.VMEM((2, b, tn), jnp.float32),
                   pltpu.SemaphoreType.DMA((2,))]
    grid_spec = pltpu.PrefetchScalarGridSpec(
        num_scalar_prefetch=1,                                  # gather row indices
        grid=(nk,),
        in_specs=[
            pl.BlockSpec((b, d), lambda k, r: (0, 0)),          # normalized tgt / temp
            pl.BlockSpec((tn, d), lambda k, r: (k, 0)),         # normalized all_aux tile
            pl.BlockSpec((1, tn), lambda k, r: (0, k)),         # all_aux row norms tile
            pl.BlockSpec(memory_space=pl.ANY),                  # Neighbor_mat (HBM)
        ],
        out_specs=[
            pl.BlockSpec((b, d), lambda k, r: (0, 0)),          # neighbor aggregation
            pl.BlockSpec((b, 128), lambda k, r: (0, 0)),        # lane-wise ttl sums
        ],
        scratch_shapes=scratch,
    )
    return pl.pallas_call(
        functools.partial(_user_side_kernel, tn=tn, resident=resident),
        out_shape=(jax.ShapeDtypeStruct((b, d), jnp.float32),
                   jax.ShapeDtypeStruct((b, 128), jnp.float32)),
        grid_spec=grid_spec,
        compiler_params=pltpu.CompilerParams(
            dimension_semantics=("arbitrary",),                 # reduction axis
            vmem_limit_bytes=vmem_limit),
    )(rows, tgt_scaled, all_n, norms, nbr_pad)


def _item_side_call(tgt_scaled, all_n, *, tn, vmem_limit):
    b, d = tgt_scaled.shape
    n_pad = all_n.shape[0]
    nk = n_pad // tn
    grid_spec = pltpu.PrefetchScalarGridSpec(
        num_scalar_prefetch=0,
        grid=(nk,),
        in_specs=[
            pl.BlockSpec((b, d), lambda k: (0, 0)),
            pl.BlockSpec((tn, d), lambda k: (k, 0)),
        ],
        out_specs=pl.BlockSpec((b, 128), lambda k: (0, 0)),
    )
    return pl.pallas_call(
        functools.partial(_item_side_kernel, tn=tn),
        out_shape=jax.ShapeDtypeStruct((b, 128), jnp.float32),
        grid_spec=grid_spec,
        compiler_params=pltpu.CompilerParams(
            dimension_semantics=("arbitrary",),
            vmem_limit_bytes=vmem_limit),
    )(tgt_scaled, all_n)


# --------------------------------------------------------------------------
# functional forward (glue = small (B,*) gathers / normalizations in jnp)
# --------------------------------------------------------------------------
def ssloss2_forward(input_u_list, input_i_list, ua_embeddings, ia_embeddings,
                    aux_beh, user_batch_indices, item_batch_indices,
                    Neighbor_mat, loss_score, *, ssl_temp, ssl_reg_inter,
                    ssl_mode_inter, tn=1024):
    assert tn % 128 == 0, "tn must be a multiple of 128"
    temp = float(ssl_temp)
    reg = float(ssl_reg_inter[aux_beh])
    inv_t = 1.0 / temp
    vmem_limit = _vmem_limit_bytes()
    total = jnp.float32(0.0)

    if ssl_mode_inter in ("user_side", "both_side"):
        bu = int(input_u_list.shape[0])
        nu = int(ua_embeddings.shape[0])
        d = int(ua_embeddings.shape[-1])
        tn_u, n_pad = _pick_tile(nu, tn)
        pad = n_pad - nu

        all_raw = ua_embeddings[:, aux_beh, :].astype(jnp.float32)        # (N, D)
        sumsq = jnp.sum(all_raw * all_raw, axis=1, keepdims=True)
        norms = jnp.sqrt(sumsq)                                           # (N, 1)
        all_n = all_raw * jax.lax.rsqrt(jnp.maximum(sumsq, _EPS * _EPS))  # (N, D)

        all_n_p = jnp.pad(all_n, ((0, pad), (0, 0))).astype(jnp.bfloat16)
        norms_p = jnp.pad(norms.reshape(1, nu), ((0, 0), (0, pad)))       # (1, N_pad) f32
        nbr_p = jnp.pad(Neighbor_mat.astype(jnp.float32), ((0, 0), (0, pad)))

        t_n = _l2_normalize(ua_embeddings[input_u_list, -1, :].astype(jnp.float32))
        a_n = _l2_normalize(ua_embeddings[input_u_list, aux_beh, :].astype(jnp.float32))
        tgt_scaled = t_n * inv_t                                          # (B, D) f32
        pos1_s = jnp.sum(t_n * a_n, axis=1) * inv_t                       # (B,)
        self_cols = _self_cols(user_batch_indices, bu)
        self_score_s = jnp.sum(t_n * all_n[self_cols], axis=1) * inv_t    # (B,)
        ls = loss_score[input_u_list].astype(jnp.float32)                 # (B,)
        rows = jnp.asarray(input_u_list, jnp.int32)

        # resident full-row gather when it comfortably fits the VMEM budget
        stream_bytes = 2 * (tn_u * d * 2 + tn_u * 4)
        fixed_bytes = bu * d * (2 + 4) + bu * 128 * 4 + (1 << 20)
        resident = (bu * n_pad * 4 + stream_bytes + fixed_bytes) <= vmem_limit // 2

        nbr_agg, ttl_lane = _user_side_call(
            rows, tgt_scaled, all_n_p, norms_p, nbr_p,
            tn=tn_u, resident=resident, vmem_limit=vmem_limit)

        # epilogue: remove padded columns (exp(0)=1 each) and the self column
        ttl = jnp.sum(ttl_lane, axis=1) - float(pad) - jnp.exp(self_score_s) + 1.0
        pos2_s = jnp.sum(t_n * _l2_normalize(nbr_agg), axis=1) * inv_t
        total = total + (-reg) * jnp.sum((pos1_s + pos2_s - 2.0 * jnp.log(ttl)) * ls)

    if ssl_mode_inter in ("item_side", "both_side"):
        bi = int(input_i_list.shape[0])
        ni = int(ia_embeddings.shape[0])
        tn_i, n_pad = _pick_tile(ni, tn)
        pad = n_pad - ni

        all_raw = ia_embeddings[:, aux_beh, :].astype(jnp.float32)
        all_n = _l2_normalize(all_raw)
        all_n_p = jnp.pad(all_n, ((0, pad), (0, 0))).astype(jnp.bfloat16)

        t_n = _l2_normalize(ia_embeddings[input_i_list, -1, :].astype(jnp.float32))
        a_n = _l2_normalize(ia_embeddings[input_i_list, aux_beh, :].astype(jnp.float32))
        tgt_scaled = t_n * inv_t
        pos_s = jnp.sum(t_n * a_n, axis=1) * inv_t
        self_cols = _self_cols(item_batch_indices, bi)
        self_score_s = jnp.sum(t_n * all_n[self_cols], axis=1) * inv_t

        ttl_lane = _item_side_call(tgt_scaled, all_n_p, tn=tn_i,
                                   vmem_limit=vmem_limit)
        ttl = jnp.sum(ttl_lane, axis=1) - float(pad) - jnp.exp(self_score_s) + 1.0
        total = total + (-reg) * jnp.sum(pos_s - jnp.log(ttl))

    return total


# --------------------------------------------------------------------------
# pure-jnp reference (mirrors the PyTorch code, all f32)
# --------------------------------------------------------------------------
def _reference_forward(input_u_list, input_i_list, ua, ia, aux_beh,
                       user_batch_indices, item_batch_indices, Neighbor_mat,
                       loss_score, *, ssl_temp, ssl_reg_inter, ssl_mode_inter):
    total = jnp.float32(0.0)
    if ssl_mode_inter in ("user_side", "both_side"):
        ls = loss_score[input_u_list]
        nbr = Neighbor_mat[input_u_list] @ ua[:, aux_beh, :]
        n_nbr = _l2_normalize(nbr)
        t = _l2_normalize(ua[input_u_list, -1, :])
        a = _l2_normalize(ua[input_u_list, aux_beh, :])
        all_n = _l2_normalize(ua[:, aux_beh, :])
        pos1 = jnp.sum(t * a, axis=1)
        pos2 = jnp.sum(t * n_nbr, axis=1)
        ttl = (t @ all_n.T).at[user_batch_indices].set(0.0)
        pos1 = jnp.exp(pos1 / ssl_temp)
        pos2 = jnp.exp(pos2 / ssl_temp)
        ttl = jnp.sum(jnp.exp(ttl / ssl_temp), axis=1)
        reg = ssl_reg_inter[aux_beh]
        total += -(jnp.sum(jnp.log(pos1 / ttl) * ls) * reg
                   + jnp.sum(jnp.log(pos2 / ttl) * ls) * reg)
    if ssl_mode_inter in ("item_side", "both_side"):
        t = _l2_normalize(ia[input_i_list, -1, :])
        a = _l2_normalize(ia[input_i_list, aux_beh, :])
        all_n = _l2_normalize(ia[:, aux_beh, :])
        pos = jnp.exp(jnp.sum(t * a, axis=1) / ssl_temp)
        ttl = (t @ all_n.T).at[item_batch_indices].set(0.0)
        ttl = jnp.sum(jnp.exp(ttl / ssl_temp), axis=1)
        total += -jnp.sum(jnp.log(pos / ttl)) * ssl_reg_inter[aux_beh]
    return total


if __name__ == "__main__":
    # hyper-params (deterministic stand-ins for data_config / args)
    ssl_temp = 0.5
    ssl_reg_inter = (0.1, 0.2, 0.3)
    ssl_mode_inter = "both_side"
    aux_beh = 0

    # small synthetic shapes (non-multiples of the tile exercise padding logic)
    Nu, Ni, n_beh, D = 200, 150, 3, 64
    Bu, Bi = 8, 8

    key = jax.random.PRNGKey(0)
    k1, k2, k3, k4, k5, k6 = jax.random.split(key, 6)
    ua_embeddings = jax.random.normal(k1, (Nu, n_beh, D), jnp.float32)
    ia_embeddings = jax.random.normal(k2, (Ni, n_beh, D), jnp.float32)
    Neighbor_mat = jax.random.uniform(k3, (Nu, Nu), jnp.float32)
    loss_score = jax.random.uniform(k4, (Nu,), jnp.float32)
    input_u_list = jax.random.permutation(k5, Nu)[:Bu]
    input_i_list = jax.random.permutation(k6, Ni)[:Bi]
    # standard pattern: zero the "self" column of each batch row in ttl_score
    user_batch_indices = (jnp.arange(Bu), input_u_list)
    item_batch_indices = (jnp.arange(Bi), input_i_list)

    out = ssloss2_forward(
        input_u_list, input_i_list, ua_embeddings, ia_embeddings, aux_beh,
        user_batch_indices, item_batch_indices, Neighbor_mat, loss_score,
        ssl_temp=ssl_temp, ssl_reg_inter=ssl_reg_inter,
        ssl_mode_inter=ssl_mode_inter, tn=1024)
    out = jax.block_until_ready(out)

    ref = _reference_forward(
        input_u_list, input_i_list, ua_embeddings, ia_embeddings, aux_beh,
        user_batch_indices, item_batch_indices, Neighbor_mat, loss_score,
        ssl_temp=ssl_temp, ssl_reg_inter=ssl_reg_inter,
        ssl_mode_inter=ssl_mode_inter)
    ref = jax.block_until_ready(ref)

    err = abs(float(out) - float(ref))
    tol = 5e-2 * max(1.0, abs(float(ref)))
    if err > tol:
        raise AssertionError(f"mismatch: pallas={float(out)} ref={float(ref)}")
    print("KERNEL_OK")
</pallas_src>

<mosaic_0001>
module attributes {stable_mosaic.version = 11 : i64} {
  func.func @_user_side_kernel(%arg0: i32, %arg1: memref<8xi32, #tpu.memory_space<smem>>, %arg2: memref<8x64xf32, #tpu.memory_space<vmem>>, %arg3: memref<256x64xbf16, #tpu.memory_space<vmem>>, %arg4: memref<1x256xf32, #tpu.memory_space<vmem>>, %arg5: memref<200x256xf32, #tpu.memory_space<any>>, %arg6: memref<8x64xf32, #tpu.memory_space<vmem>>, %arg7: memref<8x128xf32, #tpu.memory_space<vmem>>, %arg8: memref<8x256xf32, #tpu.memory_space<vmem>>, %arg9: memref<!tpu.dma_semaphore, #tpu.memory_space<semaphore_mem>>) attributes {dimension_semantics = [#tpu.dimension_semantics<arbitrary>], iteration_bounds = array<i64: 1>, scalar_prefetch = 1 : i64, scratch_operands = 2 : i64, tpu.core_type = #tpu.core_type<tc>, window_params = [{pipeline_mode = #tpu.pipeline_mode<synchronous>, transform_indices = @transform_0, window_bounds = array<i64: 8, 64>}, {transform_indices = @transform_1, window_bounds = array<i64: 256, 64>}, {transform_indices = @transform_2, window_bounds = array<i64: 1, 256>}, {}, {pipeline_mode = #tpu.pipeline_mode<synchronous>, transform_indices = @transform_4, window_bounds = array<i64: 8, 64>}, {pipeline_mode = #tpu.pipeline_mode<synchronous>, transform_indices = @transform_5, window_bounds = array<i64: 8, 128>}]} {
    %c0_i32 = arith.constant 0 : i32
    %0 = arith.cmpi eq, %arg0, %c0_i32 : i32
    %1 = arith.extui %0 : i1 to i32
    %c0_i32_0 = arith.constant 0 : i32
    %2 = arith.cmpi ne, %1, %c0_i32_0 : i32
    scf.if %2 {
      %cst_18 = arith.constant 0.000000e+00 : f32
      %29 = vector.broadcast %cst_18 : f32 to vector<8x64xf32>
      %c0_19 = arith.constant 0 : index
      %c0_20 = arith.constant 0 : index
      %30 = vector.load %arg6[%c0_19, %c0_20] : memref<8x64xf32, #tpu.memory_space<vmem>>, vector<8x64xf32>
      tpu.vector_store %arg6[%c0_19, %c0_20], %29 {strides = array<i32>} : memref<8x64xf32, #tpu.memory_space<vmem>>, vector<8x64xf32>,
      %cst_21 = arith.constant 0.000000e+00 : f32
      %31 = vector.broadcast %cst_21 : f32 to vector<8x128xf32>
      %c0_22 = arith.constant 0 : index
      %c0_23 = arith.constant 0 : index
      %32 = vector.load %arg7[%c0_22, %c0_23] : memref<8x128xf32, #tpu.memory_space<vmem>>, vector<8x128xf32>
      tpu.vector_store %arg7[%c0_22, %c0_23], %31 {strides = array<i32>} : memref<8x128xf32, #tpu.memory_space<vmem>>, vector<8x128xf32>,
    } else {
    }
    %c0_i32_1 = arith.constant 0 : i32
    %3 = arith.cmpi eq, %arg0, %c0_i32_1 : i32
    %4 = arith.extui %3 : i1 to i32
    %c0_i32_2 = arith.constant 0 : i32
    %5 = arith.cmpi ne, %4, %c0_i32_2 : i32
    scf.if %5 {
      %c0_i32_18 = arith.constant 0 : i32
      %c8_i32 = arith.constant 8 : i32
      %29 = arith.addi %c0_i32_18, %c8_i32 : i32
      %c1_i32 = arith.constant 1 : i32
      scf.for %arg10 = %c0_i32_18 to %29 step %c1_i32  : i32 {
        %c1_i32_24 = arith.constant 1 : i32
        %31 = arith.muli %arg10, %c1_i32_24 : i32
        %c0_i32_25 = arith.constant 0 : i32
        %32 = arith.addi %c0_i32_25, %31 : i32
        %33 = arith.index_cast %32 : i32 to index
        %34 = memref.load %arg1[%33] : memref<8xi32, #tpu.memory_space<smem>>
        %c0_i32_26 = arith.constant 0 : i32
        %35 = tpu.memref_slice %arg5[%34, %c0_i32_26] : memref<200x256xf32, #tpu.memory_space<any>> -> memref<1x256xf32, #tpu.memory_space<any>>
        %c0_i32_27 = arith.constant 0 : i32
        %36 = tpu.memref_slice %arg8[%32, %c0_i32_27] : memref<8x256xf32, #tpu.memory_space<vmem>> -> memref<1x256xf32, #tpu.memory_space<vmem>>
        tpu.enqueue_dma source(%35 : memref<1x256xf32, #tpu.memory_space<any>>) target(%36 : memref<1x256xf32, #tpu.memory_space<vmem>>) target_semaphore(%arg9 : memref<!tpu.dma_semaphore, #tpu.memory_space<semaphore_mem>>)
      }
      %c8_i32_19 = arith.constant 8 : i32
      %c0_i32_20 = arith.constant 0 : i32
      %c8_i32_21 = arith.constant 8 : i32
      %30 = arith.addi %c0_i32_20, %c8_i32_21 : i32
      %c1_i32_22 = arith.constant 1 : i32
      scf.for %arg10 = %c0_i32_20 to %30 step %c1_i32_22  : i32 {
        %c1_i32_24 = arith.constant 1 : i32
        %31 = arith.muli %arg10, %c1_i32_24 : i32
        %c0_i32_25 = arith.constant 0 : i32
        %32 = arith.addi %c0_i32_25, %31 : i32
        %33 = arith.index_cast %32 : i32 to index
        %34 = memref.load %arg1[%33] : memref<8xi32, #tpu.memory_space<smem>>
        %c0_i32_26 = arith.constant 0 : i32
        %35 = tpu.memref_slice %arg5[%34, %c0_i32_26] : memref<200x256xf32, #tpu.memory_space<any>> -> memref<1x256xf32, #tpu.memory_space<any>>
        %c0_i32_27 = arith.constant 0 : i32
        %36 = tpu.memref_slice %arg8[%32, %c0_i32_27] : memref<8x256xf32, #tpu.memory_space<vmem>> -> memref<1x256xf32, #tpu.memory_space<vmem>>
        tpu.wait_dma2 semaphore(%arg9 : memref<!tpu.dma_semaphore, #tpu.memory_space<semaphore_mem>>) src(%35 : memref<1x256xf32, #tpu.memory_space<any>>) dst(%36 : memref<1x256xf32, #tpu.memory_space<vmem>>)
      }
      %c8_i32_23 = arith.constant 8 : i32
    } else {
    }
    %c256_i32 = arith.constant 256 : i32
    %6 = arith.muli %arg0, %c256_i32 : i32
    %7 = tpu.assume_multiple %6, 256 : i32
    %c0 = arith.constant 0 : index
    %8 = arith.index_cast %7 : i32 to index
    %9 = vector.load %arg8[%c0, %8] : memref<8x256xf32, #tpu.memory_space<vmem>>, vector<8x256xf32>
    %c0_3 = arith.constant 0 : index
    %c0_4 = arith.constant 0 : index
    %10 = vector.load %arg3[%c0_3, %c0_4] : memref<256x64xbf16, #tpu.memory_space<vmem>>, vector<256x64xbf16>
    %c0_5 = arith.constant 0 : index
    %c0_6 = arith.constant 0 : index
    %11 = vector.load %arg4[%c0_5, %c0_6] : memref<1x256xf32, #tpu.memory_space<vmem>>, vector<1x256xf32>
    %c0_7 = arith.constant 0 : index
    %c0_8 = arith.constant 0 : index
    %12 = vector.load %arg2[%c0_7, %c0_8] : memref<8x64xf32, #tpu.memory_space<vmem>>, vector<8x64xf32>
    %13 = arith.truncf %12 : vector<8x64xf32> to vector<8x64xbf16>
    %14 = vector.broadcast %11 : vector<1x256xf32> to vector<8x256xf32>
    %15 = arith.mulf %9, %14 : vector<8x256xf32>
    %16 = arith.truncf %15 : vector<8x256xf32> to vector<8x256xbf16>
    %c0_9 = arith.constant 0 : index
    %c0_10 = arith.constant 0 : index
    %17 = vector.load %arg6[%c0_9, %c0_10] : memref<8x64xf32, #tpu.memory_space<vmem>>, vector<8x64xf32>
    %cst = arith.constant dense<0.000000e+00> : vector<8x64xf32>
    %18 = tpu.matmul %16, %10, %cst {dimension_numbers = #tpu.dot_dimension_numbers<[1], [0], [0], [1], [0, 0, 1, 1], [], []>} : vector<8x256xbf16>, vector<256x64xbf16>, vector<8x64xf32> -> vector<8x64xf32>
    %19 = arith.addf %17, %18 : vector<8x64xf32>
    %c0_11 = arith.constant 0 : index
    %c0_12 = arith.constant 0 : index
    %20 = vector.load %arg6[%c0_11, %c0_12] : memref<8x64xf32, #tpu.memory_space<vmem>>, vector<8x64xf32>
    tpu.vector_store %arg6[%c0_11, %c0_12], %19 {strides = array<i32>} : memref<8x64xf32, #tpu.memory_space<vmem>>, vector<8x64xf32>,
    %cst_13 = arith.constant dense<0.000000e+00> : vector<8x256xf32>
    %21 = tpu.matmul %13, %10, %cst_13 {dimension_numbers = #tpu.dot_dimension_numbers<[1], [1], [0], [0], [0, 0, 1, 0], [], []>} : vector<8x64xbf16>, vector<256x64xbf16>, vector<8x256xf32> -> vector<8x256xf32>
    %22 = math.exp %21 : vector<8x256xf32>
    %23 = vector.extract_strided_slice %22 {offsets = [0, 0], sizes = [8, 128], strides = [1, 1]} : vector<8x256xf32> to vector<8x128xf32>
    %24 = vector.extract_strided_slice %22 {offsets = [0, 128], sizes = [8, 128], strides = [1, 1]} : vector<8x256xf32> to vector<8x128xf32>
    %25 = arith.addf %23, %24 : vector<8x128xf32>
    %c0_14 = arith.constant 0 : index
    %c0_15 = arith.constant 0 : index
    %26 = vector.load %arg7[%c0_14, %c0_15] : memref<8x128xf32, #tpu.memory_space<vmem>>, vector<8x128xf32>
    %27 = arith.addf %26, %25 : vector<8x128xf32>
    %c0_16 = arith.constant 0 : index
    %c0_17 = arith.constant 0 : index
    %28 = vector.load %arg7[%c0_16, %c0_17] : memref<8x128xf32, #tpu.memory_space<vmem>>, vector<8x128xf32>
    tpu.vector_store %arg7[%c0_16, %c0_17], %27 {strides = array<i32>} : memref<8x128xf32, #tpu.memory_space<vmem>>, vector<8x128xf32>,
    return
  }
  func.func @transform_0(%arg0: i32, %arg1: memref<8xi32, #tpu.memory_space<smem>>) -> (i32, i32) {
    %c0_i32 = arith.constant 0 : i32
    %c0_i32_0 = arith.constant 0 : i32
    %c0_i32_1 = arith.constant 0 : i32
    return %c0_i32, %c0_i32_0 : i32, i32
  }
  func.func @transform_1(%arg0: i32, %arg1: memref<8xi32, #tpu.memory_space<smem>>) -> (i32, i32) {
    %c0_i32 = arith.constant 0 : i32
    %c0_i32_0 = arith.constant 0 : i32
    return %arg0, %c0_i32 : i32, i32
  }
  func.func @transform_2(%arg0: i32, %arg1: memref<8xi32, #tpu.memory_space<smem>>) -> (i32, i32) {
    %c0_i32 = arith.constant 0 : i32
    %c0_i32_0 = arith.constant 0 : i32
    return %c0_i32, %arg0 : i32, i32
  }
  func.func @transform_4(%arg0: i32, %arg1: memref<8xi32, #tpu.memory_space<smem>>) -> (i32, i32) {
    %c0_i32 = arith.constant 0 : i32
    %c0_i32_0 = arith.constant 0 : i32
    %c0_i32_1 = arith.constant 0 : i32
    return %c0_i32, %c0_i32_0 : i32, i32
  }
  func.func @transform_5(%arg0: i32, %arg1: memref<8xi32, #tpu.memory_space<smem>>) -> (i32, i32) {
    %c0_i32 = arith.constant 0 : i32
    %c0_i32_0 = arith.constant 0 : i32
    %c0_i32_1 = arith.constant 0 : i32
    return %c0_i32, %c0_i32_0 : i32, i32
  }
}

</mosaic_0001>

<bundles_post_ra>
// kernel: tpu_custom_call.1
= control target key start
LH: loop header
LB: loop body
LE: loop exit
PB: predicated region body
PF: predicated region fallthrough
CT: control target
= control target key end

     0   :  { %s801_s0 = inlined_call_operand.vmem [shape: s32[8], index: 0, kind: input, shape index: {}]   ;;  %s802_s1 = inlined_call_operand.vmem [shape: f32[8,64], index: 1, kind: input, shape index: {}]   ;;  %s803_s2 = inlined_call_operand.vmem [shape: bf16[256,64], index: 2, kind: input, shape index: {}]   ;;  %s804_s3 = inlined_call_operand.vmem [shape: f32[1,256], index: 3, kind: input, shape index: {}]   ;;  %s805_s4 = inlined_call_operand.hbm [shape: f32[200,256], index: 4, kind: input, shape index: {}]   ;;  %s806_s5 = inlined_call_operand.hbm [shape: f32[8,64], index: 5, kind: output, shape index: {0}]   ;;  %s807_s6 = inlined_call_operand.hbm [shape: f32[8,128], index: 6, kind: output, shape index: {1}]  }
   0x1   :  { %s12_s23 = sshll.u32 %s801_s0, 4  ;;  %s13_s23 = int_to_ptr.vmem [resolvable:$true] %s12_s23 }
   0x2   :  { %s528_s24 = scalar_lea.vmem %s13_s23, 16  ;;  %p533_p1 = scmp.lt.s32.totalorder %s13_s23, %s13_s23 }
   0x3   :  { %p529_p0 = scmp.ne.s32.totalorder %s13_s23, %s528_s24  ;;  %p534_p2 = scmp.lt.s32.totalorder %s528_s24, %s528_s24 }
   0x5   :  { %p535_p3 = por %p534_p2, %p533_p1 }
   0x7   :  { %p536_p4 = pnand %p535_p3, %p529_p0 }
   0x9   :  { %539 = shalt.err (!%p536_p4)  }
   0xa   :  { %s632_s25 = smov [#allocation5]  }
   0xb   :  { %15 = dma.vmem_to_smem %s13_s23, 16, %s632_s25, [#allocation4] }
   0xc   :  { %616 = dma.done.wait [#allocation4], 16 }
   0xd   :  { %617 = vsyncadd [#allocation4], 4294967280 }
   0xe   :  { %17 = sfence }
   0xf   :  { %18 = vsyncpa [#allocation7], 0 }
  0x10   :  { %19 = vsyncpa [#allocation9], 0  ;;  %vm31_vm0 = vcmask 523264   ;;  %v633_v0 = vmov 0.0   ;;  %s678_s0 = smov 0  }
  0x11   :  { %32 = vst.msk [vmem:[#allocation6] sm:$0xff] %vm31_vm0, %v633_v0  ;;  %33 = vst [vmem:[#allocation8] sm:$0xff] %v633_v0 }
  0x12 LB: > { %s40_s26 = sld [smem:[#allocation5 + %s626_s0]]  ;;  %s47_s27 = sshrl.u32 %s626_s0, 3  ;;  %s626_s0 = sphi %s678_s0, %s39_s0  }
  0x13   : > { %s48_s28 = sand.u32 7, %s626_s0   ;;  %s419_s29 = sshll.u32 %s47_s27, 4 }
  0x14   : > { %s50_s30 = sadd.s32 %s419_s29, %s48_s28  ;;  %s542_s20 = scalar_lea.hbm %s805_s4, 6400 }
  0x15   : > { %s51_s7 = scalar_lea.vmem [#allocation2], %s50_s30 }
  0x16   : > { %s53_s8 = sshll.u32 %s51_s7, 4  ;;  %s686_s8 = int_to_ptr.vmem [resolvable:$true] %s53_s8 }
  0x18   : > { %s41_s9 = sshrl.u32 %s40_s26, 3  ;;  %s42_s10 = sand.u32 7, %s40_s26  }
  0x19   : > { %s417_s11 = sshll.u32 %s41_s9, 4 }
  0x1a   : > { %s44_s12 = sadd.s32 %s417_s11, %s42_s10 }
  0x1b   : > { %s418_s13 = sshll.u32 %s44_s12, 4 }
  0x1c   : > { %s46_s16 = scalar_lea.hbm %s805_s4, %s418_s13 }
  0x1d   : > { %s540_s17 = scalar_lea.hbm %s46_s16, 32  ;;  %p543_p6 = scmp.lt.u32.totalorder %s46_s16, %s805_s4 }
  0x1e   : > { %p541_p5 = scmp.ne.s32.totalorder %s46_s16, %s540_s17  ;;  %p544_p7 = scmp.lt.u32.totalorder %s542_s20, %s540_s17 }
  0x1f   : > { %p546_p9 = scmp.lt.u32.totalorder %s540_s17, %s46_s16 }
  0x20   : > { %p545_p8 = por %p544_p7, %p543_p6 }
  0x22   : > { %p547_p10 = por %p546_p9, %p545_p8 }
  0x24   : > { %p548_p11 = pnand %p547_p10, %p541_p5 }
  0x26   : > { %551 = shalt.err (!%p548_p11)  }
  0x27   : > { %s552_s23 = scalar_lea.vmem %s686_s8, 32  ;;  %s634_s24 = smov [#allocation2]  }
  0x28   : > { %p553_p12 = scmp.ne.s32.totalorder %s686_s8, %s552_s23  ;;  %s554_s25 = sshll.u32 %s634_s24, 4  ;;  %s555_s25 = int_to_ptr.vmem [resolvable:$false] %s554_s25 }
  0x29   : > { %s556_s26 = scalar_lea.vmem %s555_s25, 256  ;;  %p557_p13 = scmp.lt.s32.totalorder %s686_s8, %s555_s25 }
  0x2a   : > { %p558_p0 = scmp.lt.s32.totalorder %s556_s26, %s552_s23 }
  0x2c   : > { %p559_p1 = por %p558_p0, %p557_p13 }
  0x2e   : > { %p560_p2 = pnand %p559_p1, %p553_p12 }
  0x30   : > { %563 = shalt.err (!%p560_p2)  }
  0x31   : > { %s635_s27 = smov 128   ;;  %s636_s28 = smov 1  }
  0x32   : > { %56 = dma.hbm_to_vmem [thread:$0]  %s46_s16, 32, %s686_s8, [#allocation3], %s635_s27, %s635_s27, %s636_s28 }
  0x33   : > { %s39_s0 = sadd.s32 1, %s626_s0  }
  0x34   : > { %p36_p3 = scmp.ge.s32.totalorder %s39_s0, 8  }
  0x35   :  { %s628_s29 = smov (%p36_p3), 0  }
  0x36   :  { %38 = sbr.rel (!%p36_p3) target bundleno = 18 (0x12), region = 61 }
  0x3d LB: > { %618 = dma.done.wait [#allocation3], 32  ;;  %s630_s29 = sphi %s628_s29, %s62_s29  }
  0x3e   : > { %619 = vsyncadd [#allocation3], 4294967264  ;;  %s62_s29 = sadd.s32 1, %s630_s29  }
  0x3f   : > { %p59_p4 = scmp.ge.s32.totalorder %s62_s29, 8  }
  0x40   :  { %v508_v1 = vld [vmem:[%s803_s2 + $0x40] sm:$0xff] (%p59_p4)   ;;  %v510_v3 = vld [vmem:[%s803_s2 + $0x48] sm:$0xff] (%p59_p4)   ;;  %v110_v5 = vlaneseq (%p59_p4)  ;;  %v512_v7 = vld [vmem:[%s803_s2 + $0x50] sm:$0xff] (%p59_p4)  }
  0x41   :  { %61 = sbr.rel (!%p59_p4) target bundleno = 61 (0x3d), region = 72  ;;  %v509_v2 = vld [vmem:[%s803_s2] sm:$0xff] (%p59_p4)   ;;  %478 = vmatprep.subr.msk.bf16.mxu1 (%p59_p4), %vm31_vm0, %v508_v1  ;;  %438 = vmatprep.subr.bf16.mxu0 (%p59_p4), %v508_v1  ;;  %v511_v6 = vld [vmem:[%s803_s2 + $0x8] sm:$0xff] (%p59_p4)   ;;  %v513_v10 = vld [vmem:[%s803_s2 + $0x10] sm:$0xff] (%p59_p4)  }
  0x42   :  { %v268_v4 = vsel (%p59_p4), %vm31_vm0, %v509_v2, 0  ;;  %439 = vmatpush3.bf16.msra.mxu0 (%p59_p4), %v509_v2  ;;  %v111_v8 = vshrl.u32 (%p59_p4), %v110_v5, 7  ;;  %v271_v9 = vsel (%p59_p4), %vm31_vm0, %v511_v6, 0  ;;  %v514_v11 = vld [vmem:[%s803_s2 + $0x58] sm:$0xff] (%p59_p4)   ;;  %v516_v14 = vld [vmem:[%s803_s2 + $0x60] sm:$0xff] (%p59_p4)   ;;  %v73_v16 = vld [vmem:[#allocation2 + $0x8] sm:$0xff] (%p59_p4) }
  0x43   :  { %461 = vmatpush3.bf16.xpose.msra.mxu1 (%p59_p4), %v268_v4  ;;  %440 = vmatprep.subr.bf16.mxu0 (%p59_p4), %v510_v3  ;;  %v515_v12 = vld [vmem:[%s803_s2 + $0x18] sm:$0xff] (%p59_p4)   ;;  %v107_v15 = vld [vmem:[%s802_s1] sm:$0xff] (%p59_p4)  ;;  %v274_v18 = vsel (%p59_p4), %vm31_vm0, %v513_v10, 0  ;;  %v518_v22 = vld [vmem:[%s803_s2 + $0x68] sm:$0xff] (%p59_p4)  }
  0x44   :  { %479 = vmatprep.subr.msk.bf16.mxu1 (%p59_p4), %vm31_vm0, %v510_v3  ;;  %v116_v13 = vsub.s32 (%p59_p4), 1, %v111_v8  ;;  %v106_v17 = vld [vmem:[%s804_s3] sm:$0x3] (%p59_p4)  ;;  %v108_v20 = vpack.c.bf16 (%p59_p4), %v107_v15, %v107_v15  ;;  %v112_v23 = vsub.s32 (%p59_p4), 0, %v111_v8  ;;  %v519_v25 = vld [vmem:[%s803_s2 + $0x28] sm:$0xff] (%p59_p4)   ;;  %v520_v27 = vld [vmem:[%s803_s2 + $0x70] sm:$0xff] (%p59_p4)  }
  0x45   :  { %v517_v19 = vld [vmem:[%s803_s2 + $0x20] sm:$0xff] (%p59_p4)   ;;  %v277_v30 = vsel (%p59_p4), %vm31_vm0, %v515_v12, 0  ;;  %v521_v31 = vld [vmem:[%s803_s2 + $0x30] sm:$0xff] (%p59_p4)   ;;  %v522_v32 = vld [vmem:[%s803_s2 + $0x78] sm:$0xff] (%p59_p4)   ;;  %v283_v37 = vsel (%p59_p4), %vm31_vm0, %v519_v25, 0 }
  0x46   :  { %441 = vmatpush3.bf16.msra.mxu0 (%p59_p4), %v511_v6  ;;  %v117_v21 = vrot.slane (%p59_p4), %v106_v17, %v116_v13  ;;  %476 = vmatprep.mubr.msk.bf16.mxu1 (%p59_p4), %vm31_vm0, %v108_v20  ;;  %v113_v28 = vrot.slane (%p59_p4), %v106_v17, %v112_v23  ;;  %v72_v29 = vld [vmem:[#allocation2] sm:$0xff] (%p59_p4)  ;;  %v523_v34 = vld [vmem:[%s803_s2 + $0x38] sm:$0xff] (%p59_p4)   ;;  %v280_v36 = vsel (%p59_p4), %vm31_vm0, %v517_v19, 0  ;;  %v286_v38 = vsel (%p59_p4), %vm31_vm0, %v521_v31, 0  ;;  %v124_v42 = vld [vmem:[#allocation6] sm:$0xff] (%p59_p4)  ;;  %s637_s2 = smov (%p59_p4), [#allocation6]  }
  0x47   :  { %442 = vmatprep.subr.bf16.mxu0 (%p59_p4), %v512_v7  ;;  %v289_v39 = vsel (%p59_p4), %vm31_vm0, %v523_v34, 0  ;;  %s370_s12 = sshll.u32 (%p59_p4), %s637_s2, 4  ;;  %s371_s12 = int_to_ptr.vmem [resolvable:$true] %s370_s12 }
  0x48   :  { %v121_v24 = vmul.f32 %v117_v21, %v73_v16  ;;  %v120_v33 = vmul.f32 %v113_v28, %v72_v29  ;;  %s564_s13 = scalar_lea.vmem %s371_s12, 128  ;;  %p569_p6 = scmp.lt.s32.totalorder %s371_s12, %s371_s12 }
  0x49   :  { %p565_p5 = scmp.ne.s32.totalorder %s371_s12, %s564_s13  ;;  %p570_p7 = scmp.lt.s32.totalorder %s564_s13, %s564_s13 }
  0x4a   :  { %443 = vmatpush3.bf16.msra.mxu0 %v513_v10  ;;  %v123_v26 = vpack.c.bf16 %v121_v24, %v121_v24  ;;  %v122_v35 = vpack.c.bf16 %v120_v33, %v120_v33 }
  0x4b   :  { %463 = vmatpush3.bf16.xpose.msra.mxu1 %v271_v9  ;;  %444 = vmatprep.subr.bf16.mxu0 %v514_v11  ;;  %p571_p8 = por %p570_p7, %p569_p6 }
  0x4c   :  { %480 = vmatprep.subr.msk.bf16.mxu1 %vm31_vm0, %v512_v7  ;;  %253 = vmatprep.mubr.bf16.mxu0 %v123_v26 }
  0x4d   :  { %p572_p9 = pnand %p571_p8, %p565_p5 }
  0x4e   :  { %445 = vmatpush3.bf16.msra.mxu0 %v515_v12 }
  0x4f   :  { %446 = vmatprep.subr.bf16.mxu0 %v516_v14 }
  0x52   :  { %447 = vmatpush3.bf16.msra.mxu0 %v517_v19 }
  0x53   :  { %465 = vmatpush3.bf16.xpose.msra.mxu1 %v274_v18  ;;  %448 = vmatprep.subr.bf16.mxu0 %v518_v22 }
  0x54   :  { %481 = vmatprep.subr.msk.bf16.mxu1 %vm31_vm0, %v514_v11 }
  0x56   :  { %449 = vmatpush3.bf16.msra.mxu0 %v519_v25 }
  0x57   :  { %450 = vmatprep.subr.bf16.mxu0 %v520_v27 }
  0x5a   :  { %451 = vmatpush3.bf16.msra.mxu0 %v521_v31 }
  0x5b   :  { %467 = vmatpush3.bf16.xpose.msra.mxu1 %v277_v30  ;;  %452 = vmatprep.subr.bf16.mxu0 %v522_v32 }
  0x5c   :  { %482 = vmatprep.subr.msk.bf16.mxu1 %vm31_vm0, %v516_v14 }
  0x5e   :  { %453 = vmatpush3.bf16.msra.mxu0 %v523_v34 }
  0x61   :  { %254 = vmatmul.mubr.bf16.vlgmr.msra.gmra.mrb[0].mxu0 %v122_v35 }
  0x63   :  { %469 = vmatpush3.bf16.xpose.msra.mxu1 %v280_v36 }
  0x64   :  { %483 = vmatprep.subr.msk.bf16.mxu1 %vm31_vm0, %v518_v22 }
  0x6b   :  { %471 = vmatpush3.bf16.xpose.msra.mxu1 %v283_v37 }
  0x6c   :  { %484 = vmatprep.subr.msk.bf16.mxu1 %vm31_vm0, %v520_v27 }
  0x73   :  { %473 = vmatpush3.bf16.xpose.msra.mxu1 %v286_v38 }
  0x74   :  { %485 = vmatprep.subr.msk.bf16.mxu1 %vm31_vm0, %v522_v32 }
  0x7b   :  { %475 = vmatpush3.bf16.xpose.msra.mxu1 %v289_v39 }
  0x82   :  { %477 = vmatmul.mubr.msk.bf16.vlgmr.msra.gmra.mrb[0].mxu1 %vm31_vm0, %v108_v20 }
 0x134   :  { %v454_v40 = vpop.f32.mrb[0].mxu0 }
 0x135   :  { %v455_v41 = vpop.f32.mrb[1].mxu0 }
 0x136   :  { %v456_v43 = vadd.f32 %v455_v41, %v454_v40  ;;  %v457_v44 = vpop.f32.mrb[2].mxu0 }
 0x137   :  { %v458_v45 = vpop.f32.mrb[3].mxu0 }
 0x138   :  { %v261_v46 = vadd.f32 %v456_v43, %v124_v42 }
 0x13a   :  { %263 = vst.msk [vmem:[#allocation6] sm:$0xff] %vm31_vm0, %v261_v46 }
 0x13b   :  { %575 = shalt.err (!%p572_p9)
}
 0x13c   :  { %s576_s16 = scalar_lea.hbm %s806_s5, 128 }
 0x13d   :  { %p577_p10 = scmp.ne.s32.totalorder %s806_s5, %s576_s16  ;;  %p580_p11 = scmp.lt.u32.totalorder %s576_s16, %s806_s5 }
 0x13f   :  { %p582_p12 = pnand %p580_p11, %p577_p10 }
 0x141   :  { %585 = shalt.err (!%p582_p12)
}
 0x142   :  { %373 = dma.vmem_to_hbm [thread:$0]  %s371_s12, 128, %s806_s5, [#allocation7]   ;;  %v361_v55 = vld [vmem:[#allocation8] sm:$0xff] }
 0x143   :  { %s638_s23 = smov [#allocation8]  }
 0x144   :  { %s380_s24 = sshll.u32 %s638_s23, 4  ;;  %s381_s24 = int_to_ptr.vmem [resolvable:$true] %s380_s24 }
 0x145   :  { %s586_s25 = scalar_lea.vmem %s381_s24, 128  ;;  %p591_p0 = scmp.lt.s32.totalorder %s381_s24, %s381_s24 }
 0x146   :  { %p587_p13 = scmp.ne.s32.totalorder %s381_s24, %s586_s25  ;;  %p592_p1 = scmp.lt.s32.totalorder %s586_s25, %s586_s25 }
 0x148   :  { %p593_p2 = por %p592_p1, %p591_p0 }
 0x14a   :  { %p594_p3 = pnand %p593_p2, %p587_p13 }
 0x155   :  { %v349_v47 = vpop.f32.mrb[0].mxu1 }
 0x156   :  { %v356_v48 = vmul.f32 1.442695, %v349_v47  ;;  %v351_v49 = vpop.f32.mrb[1].mxu1 }
 0x157   :  { %v358_v50 = vmul.f32 1.442695, %v351_v49  ;;  %v353_v51 = vpop.f32.mrb[2].mxu1 }
 0x158   :  { %524 = vpow2.f32 %v356_v48  ;;  %v354_v52 = vpop.f32.mrb[3].mxu1 }
 0x159   :  { %526 = vpow2.f32 %v358_v50 }
 0x162   :  { %v525_v53 = vpop.eup %524 }
 0x163   :  { %v527_v54 = vpop.eup %526 }
 0x164   :  { %v360_v56 = vadd.f32 %v527_v54, %v525_v53 }
 0x166   :  { %v362_v57 = vadd.f32 %v361_v55, %v360_v56 }
 0x168   :  { %363 = vst [vmem:[#allocation8] sm:$0xff] %v362_v57 }
 0x169   :  { %597 = shalt.err (!%p594_p3)
}
 0x16a   :  { %s598_s27 = scalar_lea.hbm %s807_s6, 128 }
 0x16b   :  { %p599_p4 = scmp.ne.s32.totalorder %s807_s6, %s598_s27  ;;  %p602_p5 = scmp.lt.u32.totalorder %s598_s27, %s807_s6 }
 0x16d   :  { %p604_p6 = pnand %p602_p5, %p599_p4 }
 0x16f   :  { %607 = shalt.err (!%p604_p6)
}
 0x170   :  { %383 = dma.vmem_to_hbm [thread:$0]  %s381_s24, 128, %s807_s6, [#allocation9]  }
 0x171   :  { %620 = dma.done.wait [#allocation7], 128  }
 0x172   :  { %621 = vsyncadd [#allocation7], 4294967168 }
 0x173   :  { %622 = dma.done.wait [#allocation9], 128  }
 0x174   :  { %623 = vsyncadd [#allocation9], 4294967168 }
 0x175   :  { %390 = vsyncpa [#allocation7], 1 }
 0x176   :  { %391 = vsyncpa [#allocation9], 1 }
 0x177   :  { %392 = vsyncmov [#allocation3] }
 0x17a   :  { %s393_s8 = vpop.sfrf %392 }
 0x17b   :  { %p437_p7 = scmp.ne.s32.totalorder %s393_s8, 0 }
 0x17d   :  { %397 = shalt.err (%p437_p7)  }

</bundles_post_ra>
